<compile_context>
chip_gen: v7x
topology: tpu7x:2x2x1
jax: 0.10.0
libtpu: 0.0.40
codegen_flags: <defaults>
</compile_context>

<pallas_src>
import jax
import jax.numpy as jnp
from jax.experimental import pallas as pl
from jax.experimental.pallas import tpu as pltpu

GN_EPS = 1e-05
GN_GROUP_SIZE = 32


def _ada_group_norm_kernel(ss_ref, x_ref, o_ref):
    """One grid point = one (sample, group).

    ss_ref : (1, 1, Cg, 2)  f32, [..., 0] = scale, [..., 1] = shift
    x_ref  : (1, 1, Cg, HW) activations for this (sample, group)
    o_ref  : (1, 1, Cg, HW) output (input dtype)
    """
    x = x_ref[0, 0].astype(jnp.float32)                  # (Cg, HW), f32 stats
    cg, hw = x.shape
    inv_count = 1.0 / (cg * hw)

    # ---- group-norm stats (two-pass, biased variance == F.group_norm) ----
    s = jnp.sum(x, axis=1, keepdims=True)                # lane reduce  (Cg, 1)
    mean = jnp.sum(s, axis=0, keepdims=True) * inv_count # sublane      (1, 1)

    d = x - mean
    v = jnp.sum(d * d, axis=1, keepdims=True)            # (Cg, 1)
    var = jnp.sum(v, axis=0, keepdims=True) * inv_count  # (1, 1)
    inv = jax.lax.rsqrt(var + GN_EPS)                    # (1, 1)

    # ---- fold norm + AdaGN modulation into a per-channel affine ----
    ss = ss_ref[0, 0]                                    # (Cg, 2) f32
    scale = ss[:, 0:1]                                   # (Cg, 1)
    shift = ss[:, 1:2]                                   # (Cg, 1)
    a = inv * (1.0 + scale)                              # (Cg, 1)
    b = shift - mean * a                                 # (Cg, 1)

    o_ref[0, 0] = (x * a + b).astype(o_ref.dtype)


def ada_group_norm(x, cond, weight, bias):
    """x: (N, C, H, W), cond: (N, cond_ch),
    weight: (2C, cond_ch), bias: (2C,)  -- nn.Linear(cond_ch, 2C) params."""
    N, C, H, W = x.shape
    G = max(1, C // GN_GROUP_SIZE)
    if C % G != 0:
        raise ValueError(f"in_channels={C} not divisible by num_groups={G}")
    Cg = C // G
    HW = H * W

    # ---- hoisted conditioning Linear (one dense XLA matmul, no weight.T) ----
    lin = jax.lax.dot_general(
        cond, weight,
        dimension_numbers=(((1,), (1,)), ((), ())),
        preferred_element_type=jnp.float32,
    ) + bias.astype(jnp.float32)                         # (N, 2C) f32
    # Pack per-channel (scale, shift) as (N, G, Cg, 2): lane-dim = 2 = full dim,
    # so the per-(n,g) block is a single tiny contiguous DMA (no size-1 lane dim).
    ss = jnp.stack([lin[:, :C], lin[:, C:]], axis=-1).reshape(N, G, Cg, 2)

    x_r = x.reshape(N, G, Cg, HW)

    itemsize = jnp.dtype(x.dtype).itemsize
    blk_bytes = Cg * HW * itemsize
    # in+out double-buffered blocks + f32 in-kernel temporaries, with headroom;
    # capped well below v7x's 64 MiB physical VMEM per TensorCore.
    vmem_limit = int(min(48 * 1024 * 1024, max(16 * 1024 * 1024, 12 * blk_bytes)))

    cost = pl.CostEstimate(
        flops=8 * N * C * HW,
        transcendentals=N * G,
        bytes_accessed=2 * N * C * HW * itemsize + N * 2 * C * 4,
    )

    out = pl.pallas_call(
        _ada_group_norm_kernel,
        out_shape=jax.ShapeDtypeStruct((N, G, Cg, HW), x.dtype),
        grid=(N, G),
        in_specs=[
            pl.BlockSpec((1, 1, Cg, 2), lambda n, g: (n, g, 0, 0)),   # scale/shift
            pl.BlockSpec((1, 1, Cg, HW), lambda n, g: (n, g, 0, 0)),  # x
        ],
        out_specs=pl.BlockSpec((1, 1, Cg, HW), lambda n, g: (n, g, 0, 0)),
        compiler_params=pltpu.CompilerParams(
            dimension_semantics=("parallel", "parallel"),
            vmem_limit_bytes=vmem_limit,
        ),
        cost_estimate=cost,
    )(ss, x_r)

    return out.reshape(N, C, H, W)


def _reference(x, cond, weight, bias):
    """Pure-JAX reference mirroring the PyTorch forward."""
    N, C, H, W = x.shape
    G = max(1, C // GN_GROUP_SIZE)
    xg = x.astype(jnp.float32).reshape(N, G, -1)
    mean = xg.mean(-1, keepdims=True)
    var = ((xg - mean) ** 2).mean(-1, keepdims=True)
    xn = ((xg - mean) / jnp.sqrt(var + GN_EPS)).reshape(N, C, H, W)
    lin = cond.astype(jnp.float32) @ weight.astype(jnp.float32).T + bias
    scale, shift = lin[:, :C], lin[:, C:]
    out = xn * (1.0 + scale)[:, :, None, None] + shift[:, :, None, None]
    return out.astype(x.dtype)


if __name__ == "__main__":
    # Small but representative shapes: in_channels=64 -> num_groups=2, Cg=32.
    N, C, H, W = 2, 64, 16, 16
    cond_ch = 32

    key = jax.random.PRNGKey(0)
    kx, kc, kw, kb = jax.random.split(key, 4)

    x = jax.random.normal(kx, (N, C, H, W), dtype=jnp.float32)
    cond = jax.random.normal(kc, (N, cond_ch), dtype=jnp.float32)

    # Deterministic nn.Linear(cond_ch, 2C)-style init: U(-1/sqrt(fan_in), +).
    bound = 1.0 / (cond_ch ** 0.5)
    weight = jax.random.uniform(kw, (2 * C, cond_ch), jnp.float32, -bound, bound)
    bias = jax.random.uniform(kb, (2 * C,), jnp.float32, -bound, bound)

    out = ada_group_norm(x, cond, weight, bias)
    out = jax.block_until_ready(out)

    ref = _reference(x, cond, weight, bias)
    assert out.shape == (N, C, H, W)
    assert jnp.allclose(out, ref, atol=2e-4, rtol=2e-4)

    print("KERNEL_OK")
</pallas_src>

<mosaic_0001>
module attributes {stable_mosaic.version = 11 : i64} {
  func.func @_ada_group_norm_kernel(%arg0: i32, %arg1: i32, %arg2: memref<1x1x32x2xf32, #tpu.memory_space<vmem>>, %arg3: memref<1x1x32x256xf32, #tpu.memory_space<vmem>>, %arg4: memref<1x1x32x256xf32, #tpu.memory_space<vmem>>) attributes {dimension_semantics = [#tpu.dimension_semantics<parallel>, #tpu.dimension_semantics<parallel>], iteration_bounds = array<i64: 2, 2>, scalar_prefetch = 0 : i64, scratch_operands = 0 : i64, tpu.core_type = #tpu.core_type<tc>, window_params = [{transform_indices = @transform_0, window_bounds = array<i64: 1, 1, 32, 2>}, {transform_indices = @transform_1, window_bounds = array<i64: 1, 1, 32, 256>}, {transform_indices = @transform_2, window_bounds = array<i64: 1, 1, 32, 256>}]} {
    %c0 = arith.constant 0 : index
    %c0_0 = arith.constant 0 : index
    %c0_1 = arith.constant 0 : index
    %c0_2 = arith.constant 0 : index
    %0 = vector.load %arg3[%c0, %c0_0, %c0_1, %c0_2] : memref<1x1x32x256xf32, #tpu.memory_space<vmem>>, vector<1x1x32x256xf32>
    %1 = vector.shape_cast %0 : vector<1x1x32x256xf32> to vector<32x256xf32>
    %cst = arith.constant dense<0.000000e+00> : vector<32xf32>
    %2 = vector.multi_reduction <add>, %1, %cst [1] : vector<32x256xf32> to vector<32xf32>
    %3 = vector.shape_cast %2 : vector<32xf32> to vector<32x1xf32>
    %cst_3 = arith.constant dense<0.000000e+00> : vector<1xf32>
    %4 = vector.multi_reduction <add>, %3, %cst_3 [0] : vector<32x1xf32> to vector<1xf32>
    %5 = vector.shape_cast %4 : vector<1xf32> to vector<1x1xf32>
    %cst_4 = arith.constant 1.22070313E-4 : f32
    %6 = vector.broadcast %cst_4 : f32 to vector<1x1xf32>
    %7 = arith.mulf %5, %6 : vector<1x1xf32>
    %8 = vector.broadcast %7 : vector<1x1xf32> to vector<32x256xf32>
    %9 = arith.subf %1, %8 : vector<32x256xf32>
    %10 = arith.mulf %9, %9 : vector<32x256xf32>
    %cst_5 = arith.constant dense<0.000000e+00> : vector<32xf32>
    %11 = vector.multi_reduction <add>, %10, %cst_5 [1] : vector<32x256xf32> to vector<32xf32>
    %12 = vector.shape_cast %11 : vector<32xf32> to vector<32x1xf32>
    %cst_6 = arith.constant dense<0.000000e+00> : vector<1xf32>
    %13 = vector.multi_reduction <add>, %12, %cst_6 [0] : vector<32x1xf32> to vector<1xf32>
    %14 = vector.shape_cast %13 : vector<1xf32> to vector<1x1xf32>
    %cst_7 = arith.constant 1.22070313E-4 : f32
    %15 = vector.broadcast %cst_7 : f32 to vector<1x1xf32>
    %16 = arith.mulf %14, %15 : vector<1x1xf32>
    %cst_8 = arith.constant 9.99999974E-6 : f32
    %17 = vector.broadcast %cst_8 : f32 to vector<1x1xf32>
    %18 = arith.addf %16, %17 : vector<1x1xf32>
    %19 = math.rsqrt %18 : vector<1x1xf32>
    %c0_9 = arith.constant 0 : index
    %c0_10 = arith.constant 0 : index
    %c0_11 = arith.constant 0 : index
    %c0_12 = arith.constant 0 : index
    %20 = vector.load %arg2[%c0_9, %c0_10, %c0_11, %c0_12] : memref<1x1x32x2xf32, #tpu.memory_space<vmem>>, vector<1x1x32x2xf32>
    %21 = vector.shape_cast %20 : vector<1x1x32x2xf32> to vector<32x2xf32>
    %22 = vector.extract_strided_slice %21 {offsets = [0, 0], sizes = [32, 1], strides = [1, 1]} : vector<32x2xf32> to vector<32x1xf32>
    %23 = vector.extract_strided_slice %21 {offsets = [0, 1], sizes = [32, 1], strides = [1, 1]} : vector<32x2xf32> to vector<32x1xf32>
    %cst_13 = arith.constant 1.000000e+00 : f32
    %24 = vector.broadcast %cst_13 : f32 to vector<32x1xf32>
    %25 = arith.addf %24, %22 : vector<32x1xf32>
    %26 = vector.broadcast %19 : vector<1x1xf32> to vector<32x1xf32>
    %27 = arith.mulf %26, %25 : vector<32x1xf32>
    %28 = vector.broadcast %7 : vector<1x1xf32> to vector<32x1xf32>
    %29 = arith.mulf %28, %27 : vector<32x1xf32>
    %30 = arith.subf %23, %29 : vector<32x1xf32>
    %31 = vector.broadcast %27 : vector<32x1xf32> to vector<32x256xf32>
    %32 = arith.mulf %1, %31 : vector<32x256xf32>
    %33 = vector.broadcast %30 : vector<32x1xf32> to vector<32x256xf32>
    %34 = arith.addf %32, %33 : vector<32x256xf32>
    %c0_14 = arith.constant 0 : index
    %c0_15 = arith.constant 0 : index
    %c0_16 = arith.constant 0 : index
    %c0_17 = arith.constant 0 : index
    %35 = vector.load %arg4[%c0_14, %c0_15, %c0_16, %c0_17] : memref<1x1x32x256xf32, #tpu.memory_space<vmem>>, vector<1x1x32x256xf32>
    %36 = vector.shape_cast %35 : vector<1x1x32x256xf32> to vector<32x256xf32>
    %37 = vector.shape_cast %34 : vector<32x256xf32> to vector<1x1x32x256xf32>
    tpu.vector_store %arg4[%c0_14, %c0_15, %c0_16, %c0_17], %37 {strides = array<i32>} : memref<1x1x32x256xf32, #tpu.memory_space<vmem>>, vector<1x1x32x256xf32>,
    return
  }
  func.func @transform_0(%arg0: i32, %arg1: i32) -> (i32, i32, i32, i32) {
    %c0_i32 = arith.constant 0 : i32
    %c0_i32_0 = arith.constant 0 : i32
    %c0_i32_1 = arith.constant 0 : i32
    return %arg0, %arg1, %c0_i32, %c0_i32_0 : i32, i32, i32, i32
  }
  func.func @transform_1(%arg0: i32, %arg1: i32) -> (i32, i32, i32, i32) {
    %c0_i32 = arith.constant 0 : i32
    %c0_i32_0 = arith.constant 0 : i32
    %c0_i32_1 = arith.constant 0 : i32
    return %arg0, %arg1, %c0_i32, %c0_i32_0 : i32, i32, i32, i32
  }
  func.func @transform_2(%arg0: i32, %arg1: i32) -> (i32, i32, i32, i32) {
    %c0_i32 = arith.constant 0 : i32
    %c0_i32_0 = arith.constant 0 : i32
    %c0_i32_1 = arith.constant 0 : i32
    return %arg0, %arg1, %c0_i32, %c0_i32_0 : i32, i32, i32, i32
  }
}

</mosaic_0001>

<bundles_post_ra>
// kernel: tpu_custom_call.1
= control target key start
LH: loop header
LB: loop body
LE: loop exit
PB: predicated region body
PF: predicated region fallthrough
CT: control target
= control target key end

     0   :  { %7 = vsyncpa [#allocation3], 0  ;;  %s1036_s0 = inlined_call_operand.vmem [shape: f32[2,2,32,2], index: 0, kind: input, shape index: {}]   ;;  %s1037_s1 = inlined_call_operand.hbm [shape: f32[2,2,32,256], index: 1, kind: input, shape index: {}]   ;;  %s1038_s2 = inlined_call_operand.hbm [shape: f32[2,2,32,256], index: 2, kind: output, shape index: {}]  }
   0x1   :  { %9 = vsyncpa [#allocation3 + $0x1], 0 }
   0x2   :  { %10 = vsyncpa [#allocation4], 0 }
   0x3   :  { %12 = vsyncpa [#allocation4 + $0x1], 0  ;;  %s776_s9 = smov 0   ;;  %s778_s10 = smov 0  }
   0x4   :  { %s780_s11 = smov 0   ;;  %s782_s12 = smov 0  }
   0x5   :  { %s784_s13 = smov 0   ;;  %s786_s14 = smov 0  }
   0x6   :  { %s788_s15 = smov 0   ;;  %s790_s16 = smov 0  }
   0x7 LB: > { %s511_s17 = sadd.s32 4294967295, %s750_s16   ;;  %s512_s18 = sadd.s32 4294967294, %s750_s16   ;;  %s750_s16 = sphi %s790_s16, %s18_s16   ;;  %s746_s15 = sphi %s788_s15, %s1053_s15   ;;  %s742_s14 = sphi %s786_s14, %s1052_s14   ;;  %s738_s13 = sphi %s784_s13, %s1051_s13   ;;  %s734_s12 = sphi %s782_s12, %s1050_s12   ;;  %s730_s11 = sphi %s780_s11, %s1049_s11   ;;  %s726_s10 = sphi %s778_s10, %s1048_s10   ;;  %s722_s9 = sphi %s776_s9, %s1047_s9  }
   0x8   : > { %s27_s19 = sadd.s32 1, %s742_s14  ;;  %s30_s20 = sadd.s32 1, %s746_s15 }
   0x9   : > { %p28_p0 = scmp.ge.s32.totalorder %s27_s19, 2  ;;  %s67_s21 = sadd.s32 1, %s730_s11 }
   0xa   : > { %p74_p1 = scmp.ne.s32.totalorder %s730_s11, %s726_s10  ;;  %p75_p2 = scmp.eq.s32.totalorder %s750_s16, 0 }
   0xb   : > { %s1055_s19 = smov (%p28_p0, %s27_s19), 0  ;;  %s1057_s20 = smov (!%p28_p0, %s30_s20), %s746_s15 }
   0xc   : > { %s63_s22 = ssub.s32 %s742_s14, %s1055_s19  ;;  %p829_p3 = por %p75_p2, %p74_p1 }
   0xd   : > { %p32_p4 = scmp.ge.s32.totalorder %s1057_s20, 2  ;;  %p80_p5 = scmp.ne.s32.totalorder %s726_s10, %s722_s9 }
   0xe   : > { %p81_p6 = scmp.eq.s32.totalorder %s511_s17, 0  ;;  %p106_p7 = scmp.eq.s32.totalorder %s511_s17, 3 }
   0xf   : > { %s1059_s20 = smov (%p32_p4, %s1057_s20), 0  ;;  %p112_p10 = scmp.eq.s32.totalorder %s512_s18, 3 }
  0x10   : > { %p837_p8 = por %p81_p6, %p80_p5  ;;  %p841_p9 = por %p106_p7, %p74_p1 }
  0x11   : > { %s62_s26 = ssub.s32 %s746_s15, %s1059_s20  ;;  %p847_p12 = por %p112_p10, %p80_p5 }
  0x12   : > { %s1042_s25 = scalar_select %p841_p9, 1, 0 }
  0x13   : > { %s64_s27 = sor.u32 %s63_s22, %s62_s26  ;;  %p543_p13 = scmp.lt.s32.totalorder %s750_s16, 4 }
  0x14   : > { %p65_p11 = scmp.eq.s32.totalorder %s64_s27, 0  ;;  %s144_s29 = sand.u32 1, %s730_s11  }
  0x15   : > { %s1043_s28 = scalar_select %p847_p12, 1, 0 }
  0x16   : > { %s854_s30 = scalar_select %p65_p11, %s730_s11, %s67_s21  }
  0x17   : > { %s515_s3 = sshll.u32 %s144_s29, 6  ;;  %s516_s4 = sshll.u32 %s742_s14, 3 }
  0x18   : > { %s517_s5 = sshll.u32 %s746_s15, 4  ;;  %s148_s6 = scalar_lea.vmem [#allocation2], %s515_s3 }
  0x19   : > { %s157_s7 = sshll.u32 %s148_s6, 4  ;;  %s154_s8 = sadd.s32 %s517_s5, %s516_s4  ;;  %s858_s7 = int_to_ptr.vmem [resolvable:$true] %s157_s7 }
  0x1a   : > { %s518_s17 = sshll.u32 %s154_s8, 7  ;;  %p862_p0 = pnand %p543_p13, %p829_p3 }
  0x1b   : > { %s869_s21 = scalar_lea.hbm %s1037_s1, %s518_s17  ;;  %s871_s27 = scalar_lea.sflag [#allocation3], %s144_s29 }
  0x1c   : > { %s622_s3 = scalar_lea.hbm %s869_s21, 1024  ;;  %p624_p2 = pneg %p862_p0 }
  0x1d   : > { %p623_p1 = scmp.ne.s32.totalorder %s869_s21, %s622_s3  ;;  %s627_s5 = scalar_lea.hbm %s1037_s1, 4096 }
  0x1e   : > { %p628_p5 = scmp.lt.u32.totalorder %s869_s21, %s1037_s1  ;;  %p629_p6 = scmp.lt.u32.totalorder %s627_s5, %s622_s3 }
  0x1f   : > { %p625_p3 = pnand %p624_p2, %p623_p1  ;;  %p631_p10 = scmp.lt.u32.totalorder %s622_s3, %s869_s21 }
  0x20   : > { %p630_p7 = por %p629_p6, %p628_p5 }
  0x21   : > { %p626_p4 = pneg %p625_p3 }
  0x22   : > { %p632_p11 = por %p631_p10, %p630_p7 }
  0x24   : > { %p633_p13 = pnand %p632_p11, %p626_p4 }
  0x26   : > { %636 = shalt.err (!%p633_p13)
}
  0x27   : > { %s637_s29 = scalar_lea.vmem %s858_s7, 1024  ;;  %s752_s17 = smov [#allocation2]  }
  0x28   : > { %p638_p1 = scmp.ne.s32.totalorder %s858_s7, %s637_s29  ;;  %s642_s22 = sshll.u32 %s752_s17, 4  ;;  %s643_s22 = int_to_ptr.vmem [resolvable:$false] %s642_s22 }
  0x29   : > { %s644_s26 = scalar_lea.vmem %s643_s22, 2048  ;;  %p645_p9 = scmp.lt.s32.totalorder %s858_s7, %s643_s22 }
  0x2a   : > { %p640_p3 = pnand %p638_p1, %p624_p2  ;;  %p646_p5 = scmp.lt.s32.totalorder %s644_s26, %s637_s29 }
  0x2c   : > { %p641_p12 = pneg %p640_p3  ;;  %p647_p6 = por %p646_p5, %p645_p9 }
  0x2e   : > { %p648_p7 = pnand %p647_p6, %p641_p12 }
  0x30   : > { %651 = shalt.err (!%p648_p7)
}
  0x31   : > { %s753_s3 = smov 256   ;;  %s754_s23 = smov 16  }
  0x32   : > { %538 = dma.hbm_to_vmem [thread:$0]  (!%p862_p0), %s869_s21, 1024, %s858_s7, %s871_s27, %s753_s3, %s753_s3, %s754_s23  }
  0x33   : > { %p519_p2 = scmp.ge.s32.totalorder %s750_s16, 1  ;;  %p165_p4 = scmp.lt.s32.totalorder %s750_s16, 5 }
  0x35   : > { %p166_p10 = pnand %p519_p2, %p165_p4 }
  0x36   : > { %s902_s4 = sand.u32 (!%p166_p10), 1, %s726_s10  }
  0x37   : > { %169 = sbr.rel (%p166_p10) target bundleno = 689 (0x2b1), region = 28  ;;  %s520_s5 = sshll.u32 (!%p166_p10), %s902_s4, 6 }
  0x38   : > { %s172_s6 = scalar_lea.sflag (!%p166_p10), [#allocation3], %s902_s4  ;;  %s175_s8 = scalar_lea.vmem (!%p166_p10), [#allocation2], %s520_s5 }
  0x3e   : > { %713 = dma.done.wait (%p837_p8), %s172_s6, 1024  }
  0x3f   : > { %715 = vsyncadd (%p837_p8), %s172_s6, 4294966272  ;;  %v912_v0 = vld [vmem:[%s175_s8] sm:$0xff]  ;;  %v914_v1 = vld [vmem:[%s175_s8 + $0x8] sm:$0xff]  ;;  %v755_v46 = vmov 0   ;;  %p205_p8 = scmp.lt.s32.totalorder %s738_s13, 1  ;;  %p207_p9 = scmp.lt.s32.totalorder %s734_s12, 1 }
  0x40   : > { %v916_v2 = vld [vmem:[%s175_s8 + $0x20] sm:$0xff]  ;;  %v222_v3 = vadd.f32 %v914_v1, %v912_v0  ;;  %v920_v4 = vld [vmem:[%s175_s8 + $0x28] sm:$0xff]  ;;  %v922_v5 = vld [vmem:[%s175_s8 + $0x10] sm:$0xff]  ;;  %616 = vset.pattern.permute.xlu0 %v755_v46  ;;  %617 = vset.pattern.permute.xlu1 %v755_v46  ;;  %s756_s3 = smov 1   ;;  %s526_s23 = sshll.u32 %s734_s12, 3 }
  0x41   : > { %v924_v6 = vld [vmem:[%s175_s8 + $0x18] sm:$0xff]  ;;  %v228_v7 = vadd.f32 %v920_v4, %v916_v2  ;;  %v928_v8 = vld [vmem:[%s175_s8 + $0x30] sm:$0xff]  ;;  %s206_s24 = scalar_select %p205_p8, %s738_s13, 1 }
  0x42   : > { %v930_v9 = vld [vmem:[%s175_s8 + $0x38] sm:$0xff]  ;;  %223 = vadd.xlane.f32.xlu0 %v222_v3  ;;  %v225_v10 = vadd.f32 %v924_v6, %v922_v5  ;;  %s208_s7 = scalar_select %p207_p9, %s734_s12, 1 }
  0x43   : > { %229 = vadd.xlane.f32.xlu1 %v228_v7  ;;  %v231_v11 = vadd.f32 %v930_v9, %v928_v8  ;;  %s523_s21 = sshll.u32 %s206_s24, 3  ;;  %s527_s6 = sshll.u32 %s738_s13, 4 }
  0x44   : > { %s522_s18 = sshll.u32 %s208_s7, 2  ;;  %s397_s8 = sadd.s32 %s527_s6, %s526_s23 }
  0x45   : > { %s211_s27 = sadd.s32 %s523_s21, %s522_s18  ;;  %s204_s24 = scalar_lea.vmem [#allocation5], %s520_s5 }
  0x46   : > { %226 = vadd.xlane.f32.xlu0 %v225_v10  ;;  %s524_s29 = sshll.u32 %s211_s27, 3  ;;  %s400_s7 = sshll.u32 %s204_s24, 4  ;;  %s977_s7 = int_to_ptr.vmem [resolvable:$true] %s400_s7 }
  0x47   : > { %232 = vadd.xlane.f32.xlu1 %v231_v11  ;;  %s213_s26 = scalar_lea.vmem %s1036_s0, %s524_s29  ;;  %s528_s12 = sshll.u32 %s397_s8, 7 }
  0x48   : > { %v285_v62 = vld [vmem:[%s213_s26 + $0x8] sm:$0xff]  ;;  %v284_v63 = vld [vmem:[%s213_s26] sm:$0xff]  ;;  %v286_v3 = vld [vmem:[%s213_s26 + $0x10] sm:$0xff]  ;;  %s982_s18 = scalar_lea.hbm %s1038_s2, %s528_s12  ;;  %s385_s21 = scalar_lea.sflag [#allocation4], %s902_s4 }
  0x49   : > { %v289_v7 = vadd.f32 1.0, %v285_v62  ;;  %v288_v10 = vadd.f32 1.0, %v284_v63  ;;  %v290_v11 = vadd.f32 1.0, %v286_v3  ;;  %s652_s27 = scalar_lea.vmem %s977_s7, 1024  ;;  %p1045_p0 = scmp.ne.s32.totalorder %s1042_s25, 0 }
  0x4a   : > { %p653_p12 = scmp.ne.s32.totalorder %s977_s7, %s652_s27  ;;  %s758_s29 = smov [#allocation5]  }
  0x4b   : > { %s656_s17 = sshll.u32 %s758_s29, 4  ;;  %s657_s17 = int_to_ptr.vmem [resolvable:$false] %s656_s17 }
  0x4c   : > { %p654_p11 = pnand %p653_p12, %p1045_p0  ;;  %s658_s22 = scalar_lea.vmem %s657_s17, 2048 }
  0x4d   : > { %p659_p1 = scmp.lt.s32.totalorder %s977_s7, %s657_s17  ;;  %p660_p3 = scmp.lt.s32.totalorder %s658_s22, %s652_s27 }
  0x4e   : > { %p655_p13 = pneg %p654_p11 }
  0x4f   : > { %p661_p5 = por %p660_p3, %p659_p1 }
  0x51   : > { %p662_p6 = pnand %p661_p5, %p655_p13 }
  0xcf   : > { %v224_v12 = vpop.xlane.xlu0 %223 }
  0xd0   : > { %v230_v13 = vpop.xlane.xlu1 %229 }
  0xd3   : > { %v227_v14 = vpop.xlane.xlu0 %226 }
  0xd4   : > { %v234_v15 = vadd.f32 %v227_v14, %v224_v12  ;;  %v233_v16 = vpop.xlane.xlu1 %232 }
  0xd6   : > { %v235_v17 = vadd.f32 %v234_v15, %v230_v13  ;;  %v287_v13 = vld [vmem:[%s213_s26 + $0x18] sm:$0xff] }
  0xd8   : > { %v236_v18 = vadd.f32 %v235_v17, %v233_v16 }
  0xda   : > { %v237_v19 = vrot.slane %v236_v18, 4 }
  0xdc   : > { %v238_v20 = vadd.f32 %v237_v19, %v236_v18  ;;  %v291_v19 = vadd.f32 1.0, %v287_v13 }
  0xde   : > { %v239_v21 = vrot.slane %v238_v20, 2 }
  0xe0   : > { %v240_v22 = vadd.f32 %v239_v21, %v238_v20 }
  0xe2   : > { %v241_v23 = vrot.slane %v240_v22, 1 }
  0xe4   : > { %v242_v24 = vadd.f32 %v241_v23, %v240_v22  ;;  %v757_v23 = vmov 1  }
  0xe6   : > { %v936_v25 = vmul.f32 0.00012207031, %v242_v24 }
  0xe8   : > { %v246_v26 = vsub.f32 %v922_v5, %v936_v25  ;;  %v247_v27 = vsub.f32 %v924_v6, %v936_v25  ;;  %v244_v28 = vsub.f32 %v912_v0, %v936_v25  ;;  %v245_v29 = vsub.f32 %v914_v1, %v936_v25 }
  0xe9   : > { %v250_v30 = vsub.f32 %v928_v8, %v936_v25  ;;  %v251_v31 = vsub.f32 %v930_v9, %v936_v25  ;;  %v248_v32 = vsub.f32 %v916_v2, %v936_v25  ;;  %v249_v33 = vsub.f32 %v920_v4, %v936_v25 }
  0xea   : > { %v254_v34 = vmul.f32 %v246_v26, %v246_v26  ;;  %v255_v35 = vmul.f32 %v247_v27, %v247_v27  ;;  %v252_v36 = vmul.f32 %v244_v28, %v244_v28  ;;  %v253_v37 = vmul.f32 %v245_v29, %v245_v29 }
  0xeb   : > { %v258_v38 = vmul.f32 %v250_v30, %v250_v30  ;;  %v259_v39 = vmul.f32 %v251_v31, %v251_v31  ;;  %v256_v42 = vmul.f32 %v248_v32, %v248_v32  ;;  %v257_v43 = vmul.f32 %v249_v33, %v249_v33 }
  0xec   : > { %v263_v40 = vadd.f32 %v255_v35, %v254_v34  ;;  %v260_v41 = vadd.f32 %v253_v37, %v252_v36 }
  0xed   : > { %v269_v44 = vadd.f32 %v259_v39, %v258_v38  ;;  %v266_v45 = vadd.f32 %v257_v43, %v256_v42 }
  0xee   : > { %264 = vadd.xlane.f32.xlu1 %v263_v40  ;;  %261 = vadd.xlane.f32.xlu0 %v260_v41 }
  0xf2   : > { %270 = vadd.xlane.f32.xlu1 %v269_v44  ;;  %267 = vadd.xlane.f32.xlu0 %v266_v45 }
 0x17b   : > { %v265_v47 = vpop.xlane.xlu1 %264  ;;  %v262_v48 = vpop.xlane.xlu0 %261 }
 0x17c   : > { %v272_v49 = vadd.f32 %v265_v47, %v262_v48 }
 0x17f   : > { %v268_v50 = vpop.xlane.xlu0 %267  ;;  %v271_v52 = vpop.xlane.xlu1 %270 }
 0x180   : > { %v273_v51 = vadd.f32 %v272_v49, %v268_v50 }
 0x182   : > { %v274_v53 = vadd.f32 %v273_v51, %v271_v52 }
 0x184   : > { %v275_v54 = vrot.slane %v274_v53, 4 }
 0x186   : > { %v276_v55 = vadd.f32 %v275_v54, %v274_v53 }
 0x188   : > { %v277_v56 = vrot.slane %v276_v55, 2 }
 0x18a   : > { %v278_v57 = vadd.f32 %v277_v56, %v276_v55 }
 0x18c   : > { %v279_v58 = vrot.slane %v278_v57, 1 }
 0x18e   : > { %v280_v59 = vadd.f32 %v279_v58, %v278_v57 }
 0x190   : > { %v281_v60 = vmul.f32 0.00012207031, %v280_v59 }
 0x192   : > { %v282_v61 = vadd.f32 1e-05, %v281_v60 }
 0x194   : > { %620 = vrsqrt.f32 %v282_v61 }
 0x19e   : > { %v621_v12 = vpop.eup %620 }
 0x19f   : > { %v293_v14 = vmul.f32 %v621_v12, %v289_v7  ;;  %v292_v15 = vmul.f32 %v621_v12, %v288_v10  ;;  %v294_v18 = vmul.f32 %v621_v12, %v290_v11  ;;  %v295_v21 = vmul.f32 %v621_v12, %v291_v19 }
 0x1a1   : > { %v297_v16 = vmul.f32 %v293_v14, %v936_v25  ;;  %v296_v17 = vmul.f32 %v292_v15, %v936_v25  ;;  %v298_v20 = vmul.f32 %v294_v18, %v936_v25  ;;  %v299_v22 = vmul.f32 %v295_v21, %v936_v25 }
 0x1a3   : > { %306 = vrot.lane.b32.xlu1 %v297_v16, %s756_s3  ;;  %304 = vrot.lane.b32.xlu0 %v296_v17, %s756_s3 }
 0x1a7   : > { %308 = vrot.lane.b32.xlu1 %v298_v20, %s756_s3  ;;  %322 = vperm.xlu0 %616, %v292_v15  }
 0x1ab   : > { %310 = vrot.lane.b32.xlu1 %v299_v22, %s756_s3  ;;  %337 = vperm.xlu0 %616, %v295_v21  }
 0x1af   : > { %327 = vperm.xlu1 %617, %v293_v14   ;;  %619 = vset.pattern.permute.xlu0 %v757_v23 }
 0x1b3   : > { %332 = vperm.xlu1 %617, %v294_v18  }
 0x1b7   : > { %618 = vset.pattern.permute.xlu1 %v757_v23 }
 0x215   : > { %v307_v24 = vpop.permute.xlu1 %306  ;;  %v305_v26 = vpop.permute.xlu0 %304 }
 0x216   : > { %v317_v27 = vsub.f32 %v285_v62, %v307_v24  ;;  %v316_v28 = vsub.f32 %v284_v63, %v305_v26 }
 0x218   : > { %355 = vperm.xlu0 %619, %v317_v27   ;;  %350 = vperm.xlu1 %618, %v316_v28  }
 0x219   : > { %v309_v29 = vpop.permute.xlu1 %308 }
 0x21a   : > { %v318_v30 = vsub.f32 %v286_v3, %v309_v29 }
 0x21c   : > { %360 = vperm.xlu1 %618, %v318_v30  }
 0x21d   : > { %v311_v31 = vpop.permute.xlu1 %310 }
 0x21e   : > { %v319_v25 = vsub.f32 %v287_v13, %v311_v31 }
 0x220   : > { %365 = vperm.xlu1 %618, %v319_v25  }
 0x226   : > { %v323_v32 = vpop.permute.xlu0 %322 }
 0x227   : > { %v340_v36 = vmul.f32 %v323_v32, %v912_v0  ;;  %v341_v37 = vmul.f32 %v323_v32, %v914_v1 }
 0x22a   : > { %v338_v34 = vpop.permute.xlu0 %337 }
 0x22b   : > { %v347_v48 = vmul.f32 %v338_v34, %v930_v9 }
 0x22e   : > { %v328_v33 = vpop.permute.xlu1 %327 }
 0x22f   : > { %v342_v38 = vmul.f32 %v328_v33, %v922_v5  ;;  %v343_v39 = vmul.f32 %v328_v33, %v924_v6  ;;  %v346_v6 = vmul.f32 %v338_v34, %v928_v8 }
 0x232   : > { %v333_v35 = vpop.permute.xlu1 %332 }
 0x233   : > { %v344_v46 = vmul.f32 %v333_v35, %v916_v2  ;;  %v345_v47 = vmul.f32 %v333_v35, %v920_v4 }
 0x297   : > { %v351_v40 = vpop.permute.xlu1 %350  ;;  %v356_v41 = vpop.permute.xlu0 %355 }
 0x298   : > { %v368_v42 = vadd.f32 %v351_v40, %v340_v36  ;;  %v369_v43 = vadd.f32 %v351_v40, %v341_v37  ;;  %v370_v44 = vadd.f32 %v356_v41, %v342_v38  ;;  %v371_v45 = vadd.f32 %v356_v41, %v343_v39 }
 0x29a   : > { %376 = vst [vmem:[%s204_s24] sm:$0xff] %v368_v42  ;;  %377 = vst [vmem:[%s204_s24 + $0x8] sm:$0xff] %v369_v43 }
 0x29b   : > { %378 = vst [vmem:[%s204_s24 + $0x10] sm:$0xff] %v370_v44  ;;  %379 = vst [vmem:[%s204_s24 + $0x18] sm:$0xff] %v371_v45  ;;  %v361_v0 = vpop.permute.xlu1 %360 }
 0x29c   : > { %v372_v1 = vadd.f32 %v361_v0, %v344_v46  ;;  %v373_v5 = vadd.f32 %v361_v0, %v345_v47 }
 0x29e   : > { %380 = vst [vmem:[%s204_s24 + $0x20] sm:$0xff] %v372_v1  ;;  %381 = vst [vmem:[%s204_s24 + $0x28] sm:$0xff] %v373_v5 }
 0x29f   : > { %v366_v2 = vpop.permute.xlu1 %365 }
 0x2a0   : > { %v374_v4 = vadd.f32 %v366_v2, %v346_v6  ;;  %v375_v49 = vadd.f32 %v366_v2, %v347_v48 }
 0x2a2   : > { %382 = vst [vmem:[%s204_s24 + $0x30] sm:$0xff] %v374_v4  ;;  %383 = vst [vmem:[%s204_s24 + $0x38] sm:$0xff] %v375_v49 }
 0x2a3   : > { %665 = shalt.err (!%p662_p6)
}
 0x2a4   : > { %s666_s26 = scalar_lea.hbm %s982_s18, 1024  ;;  %s670_s6 = scalar_lea.hbm %s1038_s2, 4096 }
 0x2a5   : > { %p667_p7 = scmp.ne.s32.totalorder %s982_s18, %s666_s26  ;;  %p671_p10 = scmp.lt.u32.totalorder %s982_s18, %s1038_s2 }
 0x2a6   : > { %p672_p8 = scmp.lt.u32.totalorder %s670_s6, %s666_s26  ;;  %p674_p12 = scmp.lt.u32.totalorder %s666_s26, %s982_s18 }
 0x2a7   : > { %p668_p2 = pnand %p667_p7, %p1045_p0 }
 0x2a8   : > { %p673_p9 = por %p672_p8, %p671_p10 }
 0x2a9   : > { %p669_p4 = pneg %p668_p2 }
 0x2aa   : > { %p675_p11 = por %p674_p12, %p673_p9 }
 0x2ac   : > { %p676_p13 = pnand %p675_p11, %p669_p4 }
 0x2ae   : > { %679 = shalt.err (!%p676_p13)
}
 0x2af   : > { %s759_s12 = smov 256   ;;  %s760_s13 = smov 16  }
 0x2b0   : > { %533 = dma.vmem_to_hbm [thread:$0]  (%p1045_p0), %s977_s7, 1024, %s982_s18, %s385_s21, %s759_s12, %s759_s12, %s760_s13  }
 0x2b1 PF: > { %p544_p1 = scmp.ge.s32.totalorder %s750_s16, 2  ;;  %s415_s5 = sand.u32 1, %s722_s9  }
 0x2b2   : > { %p1046_p3 = scmp.ne.s32.totalorder %s1043_s28, 0  ;;  %s416_s27 = scalar_lea.sflag [#allocation4], %s415_s5 }
 0x2b4   : > { %p540_p5 = pnand %p544_p1, %p1046_p3 }
 0x2b6   : > { %717 = dma.done.wait (!%p540_p5), %s416_s27, 1024  }
 0x2b7   : > { %719 = vsyncadd (!%p540_p5), %s416_s27, 4294966272  ;;  %s18_s16 = sadd.s32 1, %s750_s16   ;;  %s1047_s9 = smov %s726_s10 }
 0x2b8   : > { %p15_p6 = scmp.ge.s32.totalorder %s18_s16, 6   ;;  %s1048_s10 = smov %s730_s11 }
 0x2b9   : > { %s1049_s11 = smov %s854_s30  ;;  %s1050_s12 = smov %s742_s14 }
 0x2ba   : > { %s1051_s13 = smov %s746_s15  ;;  %s1052_s14 = smov %s1055_s19 }
 0x2bb   : > { %s1053_s15 = smov %s1059_s20  ;;  %17 = sbr.rel (!%p15_p6) target bundleno = 7 (0x7), region = 76 }
 0x2c2   :  { %421 = vsyncpa [#allocation3], 1 }
 0x2c3   :  { %423 = vsyncpa [#allocation3 + $0x1], 1 }
 0x2c4   :  { %424 = vsyncpa [#allocation4], 1 }
 0x2c5   :  { %426 = vsyncpa [#allocation4 + $0x1], 1 }

</bundles_post_ra>
